<compile_context>
chip_gen: v7x
topology: tpu7x:2x2x1
jax: 0.10.0
libtpu: 0.0.40
codegen_flags: <defaults>
</compile_context>

<pallas_src>
import jax
import jax.numpy as jnp
from jax.experimental import pallas as pl
from jax.experimental.pallas import tpu as pltpu


def _round_up(x: int, m: int) -> int:
    return ((x + m - 1) // m) * m


def _embed_kernel(tok_ref, emb_ref, out_ref):
    # tok_ref: VMEM (1, T, 1) int32 — this chunk's (clamped) position ids.
    # emb_ref: VMEM (P, E)          — full embedding table (resident across grid).
    # out_ref: VMEM (T, E)          — output rows for this chunk.
    tok = tok_ref[0]                                      # (T, 1) int32
    T = tok.shape[0]
    P = emb_ref.shape[0]

    # In-VMEM gather as an exact one-hot selector matmul on the MXU.
    pos = jax.lax.broadcasted_iota(jnp.int32, (T, P), 1)  # (T, P)
    onehot = (pos == tok).astype(emb_ref.dtype)           # (T, P), rows are 0/1
    out = jnp.dot(onehot, emb_ref[...], preferred_element_type=jnp.float32)
    out_ref[...] = out.astype(out_ref.dtype)


def positional_encoding(tokens: jax.Array, embedding: jax.Array,
                        *, chunk: int = 256) -> jax.Array:
    """Equivalent of PositionalEncoding.forward: embedding[tokens].

    tokens:    int array, shape (B, S)
    embedding: (max_positions, emb_size) float array
    returns:   (B, S, emb_size), dtype of `embedding`
    """
    B, S = tokens.shape
    P, E = embedding.shape
    N = B * S

    # Clamp out-of-range ids (nn.Embedding would error; keep reads in-bounds).
    tok_flat = jnp.clip(tokens.reshape(N).astype(jnp.int32), 0, P - 1)

    # Tokens handled per grid step; always a multiple of 8 sublanes.
    T = min(_round_up(chunk, 8), _round_up(N, 8))
    N_pad = _round_up(N, T)
    num_chunks = N_pad // T

    tok_padded = jnp.pad(tok_flat, (0, N_pad - N)).reshape(num_chunks, T, 1)

    grid_spec = pltpu.PrefetchScalarGridSpec(
        num_scalar_prefetch=0,
        grid=(num_chunks,),
        in_specs=[
            # Token-id chunk for this grid step.
            pl.BlockSpec((1, T, 1), lambda i: (i, 0, 0)),
            # Whole embedding table; same block every step -> fetched once,
            # stays resident in VMEM.
            pl.BlockSpec((P, E), lambda i: (0, 0)),
        ],
        out_specs=pl.BlockSpec((T, E), lambda i: (i, 0)),
    )

    out_flat = pl.pallas_call(
        _embed_kernel,
        out_shape=jax.ShapeDtypeStruct((N_pad, E), embedding.dtype),
        grid_spec=grid_spec,
        compiler_params=pltpu.CompilerParams(
            dimension_semantics=("parallel",),
        ),
    )(tok_padded, embedding)

    return out_flat[:N].reshape(B, S, E)


if __name__ == "__main__":
    # Module hyperparameters (small, consistent with the forward pass).
    max_positions = 64
    emb_size = 32
    B, S = 2, 8

    key = jax.random.PRNGKey(0)
    k_emb, k_tok = jax.random.split(key)

    # nn.Embedding default init: weight ~ N(0, 1)
    embedding = jax.random.normal(k_emb, (max_positions, emb_size), dtype=jnp.float32)
    tokens = jax.random.randint(k_tok, (B, S), 0, max_positions, dtype=jnp.int32)

    out = positional_encoding(tokens, embedding)
    out = jax.block_until_ready(out)

    # Reference check (plain JAX gather).
    ref = embedding[tokens]
    assert out.shape == (B, S, emb_size), out.shape
    assert jnp.allclose(out, ref), "mismatch vs reference gather"

    print("KERNEL_OK")
</pallas_src>

<mosaic_0001>
module attributes {stable_mosaic.version = 11 : i64} {
  func.func @_embed_kernel(%arg0: i32, %arg1: memref<1x16x1xi32, #tpu.memory_space<vmem>>, %arg2: memref<64x32xf32, #tpu.memory_space<vmem>>, %arg3: memref<16x32xf32, #tpu.memory_space<vmem>>) attributes {dimension_semantics = [#tpu.dimension_semantics<parallel>], iteration_bounds = array<i64: 1>, scalar_prefetch = 0 : i64, scratch_operands = 0 : i64, tpu.core_type = #tpu.core_type<tc>, window_params = [{transform_indices = @transform_0, window_bounds = array<i64: 1, 16, 1>}, {pipeline_mode = #tpu.pipeline_mode<synchronous>, transform_indices = @transform_1, window_bounds = array<i64: 64, 32>}, {transform_indices = @transform_2, window_bounds = array<i64: 16, 32>}]} {
    %c0 = arith.constant 0 : index
    %c0_0 = arith.constant 0 : index
    %c0_1 = arith.constant 0 : index
    %0 = vector.load %arg1[%c0, %c0_0, %c0_1] : memref<1x16x1xi32, #tpu.memory_space<vmem>>, vector<1x16x1xi32>
    %1 = vector.shape_cast %0 : vector<1x16x1xi32> to vector<16x1xi32>
    %2 = tpu.iota {dimensions = array<i32: 1>} : vector<16x64xi32>
    %3 = vector.broadcast %1 : vector<16x1xi32> to vector<16x64xi32>
    %4 = arith.cmpi eq, %2, %3 : vector<16x64xi32>
    %5 = arith.extui %4 : vector<16x64xi1> to vector<16x64xi32>
    %6 = arith.sitofp %5 : vector<16x64xi32> to vector<16x64xf32>
    %c0_2 = arith.constant 0 : index
    %c0_3 = arith.constant 0 : index
    %7 = vector.load %arg2[%c0_2, %c0_3] : memref<64x32xf32, #tpu.memory_space<vmem>>, vector<64x32xf32>
    %cst = arith.constant dense<0.000000e+00> : vector<16x32xf32>
    %8 = tpu.matmul %6, %7, %cst {dimension_numbers = #tpu.dot_dimension_numbers<[1], [0], [0], [1], [0, 0, 1, 1], [], []>} : vector<16x64xf32>, vector<64x32xf32>, vector<16x32xf32> -> vector<16x32xf32>
    %c0_4 = arith.constant 0 : index
    %c0_5 = arith.constant 0 : index
    %9 = vector.load %arg3[%c0_4, %c0_5] : memref<16x32xf32, #tpu.memory_space<vmem>>, vector<16x32xf32>
    tpu.vector_store %arg3[%c0_4, %c0_5], %8 {strides = array<i32>} : memref<16x32xf32, #tpu.memory_space<vmem>>, vector<16x32xf32>,
    return
  }
  func.func @transform_0(%arg0: i32) -> (i32, i32, i32) {
    %c0_i32 = arith.constant 0 : i32
    %c0_i32_0 = arith.constant 0 : i32
    %c0_i32_1 = arith.constant 0 : i32
    return %arg0, %c0_i32, %c0_i32_0 : i32, i32, i32
  }
  func.func @transform_1(%arg0: i32) -> (i32, i32) {
    %c0_i32 = arith.constant 0 : i32
    %c0_i32_0 = arith.constant 0 : i32
    %c0_i32_1 = arith.constant 0 : i32
    return %c0_i32, %c0_i32_0 : i32, i32
  }
  func.func @transform_2(%arg0: i32) -> (i32, i32) {
    %c0_i32 = arith.constant 0 : i32
    %c0_i32_0 = arith.constant 0 : i32
    return %arg0, %c0_i32 : i32, i32
  }
}

</mosaic_0001>

<bundles_post_ra>
// kernel: tpu_custom_call.1
= control target key start
LH: loop header
LB: loop body
LE: loop exit
PB: predicated region body
PF: predicated region fallthrough
CT: control target
= control target key end

     0   :  { %v216_v2 = vmov 0   ;;  %s278_s0 = inlined_call_operand.vmem [shape: s32[1,16,1], index: 0, kind: input, shape index: {}]   ;;  %s279_s1 = inlined_call_operand.vmem [shape: f32[64,32], index: 1, kind: input, shape index: {}]   ;;  %s280_s2 = inlined_call_operand.hbm [shape: f32[16,32], index: 2, kind: output, shape index: {}]  }
   0x1   :  { %v12_v0 = vld [vmem:[%s278_s0] sm:$0xff]  ;;  %191 = vset.pattern.permute.xlu0 %v216_v2  ;;  %v29_v3 = vld [vmem:[%s279_s1 + $0x8] sm:$0xff]  ;;  %v30_v4 = vld [vmem:[%s279_s1 + $0x10] sm:$0xff] }
   0x2   :  { %v28_v1 = vld [vmem:[%s279_s1] sm:$0xff]  ;;  %v31_v5 = vld [vmem:[%s279_s1 + $0x18] sm:$0xff]  ;;  %17 = vperm.xlu0 %191, %v12_v0   ;;  %v13_v6 = vld [vmem:[%s278_s0 + $0x8] sm:$0xff] }
   0x3   :  { %v170_v7 = vpack.c.bf16 %v29_v3, %v28_v1  ;;  %v174_v8 = vpack.c.bf16 %v31_v5, %v30_v4  ;;  %v32_v9 = vld [vmem:[%s279_s1 + $0x20] sm:$0xff]  ;;  %v33_v10 = vld [vmem:[%s279_s1 + $0x28] sm:$0xff] }
   0x4   :  { %7 = vsyncpa [#allocation3], 0  ;;  %v178_v11 = vpack.c.bf16 %v33_v10, %v32_v9  ;;  %v34_v12 = vld [vmem:[%s279_s1 + $0x30] sm:$0xff]  ;;  %v35_v13 = vld [vmem:[%s279_s1 + $0x38] sm:$0xff]  ;;  %v14_v15 = vlaneseq  ;;  %vm36_vm0 = vcmask 523264   ;;  %v217_v18 = vmov 0.0  }
   0x5   :  { %171 = vmatprep.subr.bf16.mxu0 %v170_v7  ;;  %v182_v14 = vpack.c.bf16 %v35_v13, %v34_v12  ;;  %s218_s28 = smov [#allocation2]   ;;  %vm118_vm3 = vcmask 261120  }
   0x6   :  { %173 = vmatpush3.bf16.msra.mxu0 %v170_v7  ;;  %20 = vperm.xlu0 %191, %v13_v6   ;;  %v15_v16 = vand.u32 127, %v14_v15  ;;  %s126_s1 = sshll.u32 %s218_s28, 4  ;;  %s127_s1 = int_to_ptr.vmem [resolvable:$true] %s126_s1 }
   0x7   :  { %175 = vmatprep.subr.bf16.mxu0 %v174_v8  ;;  %s192_s29 = scalar_lea.vmem %s127_s1, 256  ;;  %p197_p1 = scmp.lt.s32.totalorder %s127_s1, %s127_s1 }
   0x8   :  { %p193_p0 = scmp.ne.s32.totalorder %s127_s1, %s192_s29  ;;  %p198_p2 = scmp.lt.s32.totalorder %s192_s29, %s192_s29 }
   0xa   :  { %177 = vmatpush3.bf16.msra.mxu0 %v174_v8  ;;  %p199_p3 = por %p198_p2, %p197_p1 }
   0xb   :  { %179 = vmatprep.subr.bf16.mxu0 %v178_v11 }
   0xc   :  { %p200_p4 = pnand %p199_p3, %p193_p0 }
   0xe   :  { %181 = vmatpush3.bf16.msra.mxu0 %v178_v11 }
   0xf   :  { %183 = vmatprep.subr.bf16.mxu0 %v182_v14 }
  0x12   :  { %185 = vmatpush3.bf16.msra.mxu0 %v182_v14 }
  0x81   :  { %v18_v17 = vpop.permute.xlu0 %17 }
  0x82   :  { %vm22_vm1 = vcmp.eq.s32.totalorder %v15_v16, %v18_v17 }
  0x83   :  { %v137_v19 = vsel %vm22_vm1, 1.0, %v217_v18 }
  0x84   :  { %167 = vmatprep.mubr.msk.f32.mxu0 %vm36_vm0, %v137_v19 }
  0x85   :  { %v21_v20 = vpop.permute.xlu0 %20 }
  0x86   :  { %vm23_vm2 = vcmp.eq.s32.totalorder %v15_v16, %v21_v20 }
  0x87   :  { %v138_v21 = vsel %vm23_vm2, 1.0, %v217_v18 }
  0x88   :  { %168 = vmatmul.mubr.msk.f32.vlgmr.msra.gmra.mrb[0].mxu0 %vm36_vm0, %v138_v21 }
 0x15b   :  { %v169_v22 = vpop.f32.mrb[0].mxu0 }
 0x15c   :  { %120 = vst.msk [vmem:[#allocation2 + $0x8] sm:$0xff] %vm118_vm3, %v169_v22  ;;  %v109_v23 = vpop.f32.mrb[1].mxu0 }
 0x15d   :  { %119 = vst.msk [vmem:[#allocation2] sm:$0xff] %vm118_vm3, %v109_v23 }
 0x15e   :  { %203 = shalt.err (!%p200_p4)
}
 0x15f   :  { %s204_s4 = scalar_lea.hbm %s280_s2, 256 }
 0x160   :  { %p205_p5 = scmp.ne.s32.totalorder %s280_s2, %s204_s4  ;;  %p208_p6 = scmp.lt.u32.totalorder %s204_s4, %s280_s2 }
 0x162   :  { %p210_p7 = pnand %p208_p6, %p205_p5 }
 0x164   :  { %213 = shalt.err (!%p210_p7)
}
 0x165   :  { %s219_s9 = smov 128   ;;  %s220_s10 = smov 8  }
 0x166   :  { %132 = dma.vmem_to_hbm [thread:$0]  %s127_s1, 256, %s280_s2, [#allocation3], %s219_s9, %s219_s9, %s220_s10  }
 0x167   :  { %214 = dma.done.wait [#allocation3], 256  }
 0x168   :  { %215 = vsyncadd [#allocation3], 4294967040 }
 0x169   :  { %136 = vsyncpa [#allocation3], 1 }

</bundles_post_ra>
